<compile_context>
chip_gen: v7x
topology: tpu7x:2x2x1
jax: 0.10.0
libtpu: 0.0.40
codegen_flags: <defaults>
</compile_context>

<pallas_src>
import jax
import jax.numpy as jnp
from jax.experimental import pallas as pl
from jax.experimental.pallas import tpu as pltpu


def rnn_fc_kernel(xp_ref, w_in_ref, bias_ref, w_rec_ref, w_fc_ref, b_fc_ref,
                  out_ref):
    """Whole RNN recurrence (wavefront-scheduled) + final Linear.

    xp_ref   : (S*Bp, Dp)   time-major input, batch-padded B->Bp, feature-
                            padded D->Dp; rows for wavefront steps s >= T zero.
    w_in_ref : (Dp, L*M)    W_ih[0]^T in rows [:D] of lane-block 0, else 0.
    bias_ref : (S*Bp, L*M)  per-step fused biases (block l zero for s < l).
    w_rec_ref: (L*M, L*M)   block recurrent weight (see module docstring).
    w_fc_ref : (L*M, Kp)    fc weight^T in the top-layer row block, else 0.
    b_fc_ref : (1, Kp)      fc bias, lane-padded.
    out_ref  : (Bp, Kp)     padded output; caller reads [:B, :K].
    """
    SB, LM = bias_ref.shape
    Bp, _ = out_ref.shape
    S = SB // Bp

    # ---- off the serial path: input projection for all wavefront steps -----
    # One MXU call directly into the wide (L*M)-lane layout, plus the
    # precomputed bias schedule -> per-step additive term.
    addend = (jnp.dot(xp_ref[...], w_in_ref[...],
                      preferred_element_type=jnp.float32)
              + bias_ref[...])                                   # (S*Bp, L*M)

    w_rec = w_rec_ref[...]                                       # hoisted load

    # ---- wavefront recurrence: state[:, l*M:(l+1)*M] == h_l(s-1-l) ---------
    # S = T + L - 1 serial MXU issues total; the per-step body is exactly
    # one matmul + one add + one max.
    state = jnp.zeros((Bp, LM), jnp.float32)
    for s in range(S):                       # S is a small compile-time const
        pre = (jnp.dot(state, w_rec, preferred_element_type=jnp.float32)
               + addend[s * Bp:(s + 1) * Bp, :])
        state = jnp.maximum(pre, 0.0)        # relu

    # ---- fc on h_{L-1}(T-1): top-layer block of the final state ------------
    # w_fc has nonzero rows only in that block, so no lane slice is needed.
    out_ref[...] = (jnp.dot(state, w_fc_ref[...],
                            preferred_element_type=jnp.float32)
                    + b_fc_ref[...])


def rnn_forward(xp, w_in, bias_sched, w_rec, w_fc, b_fc, *, bp, kp):
    """Run the kernel; returns the padded (Bp, Kp) output."""
    return pl.pallas_call(
        rnn_fc_kernel,
        out_shape=jax.ShapeDtypeStruct((bp, kp), jnp.float32),
        in_specs=[pl.BlockSpec(memory_space=pltpu.MemorySpace.VMEM)] * 6,
        out_specs=pl.BlockSpec(memory_space=pltpu.MemorySpace.VMEM),
    )(xp, w_in, bias_sched, w_rec, w_fc, b_fc)


def ref_forward(X, wih_list, whh_list, bih_list, bhh_list, wfc, bfc):
    """Pure-JAX reference matching torch.nn.RNN(nonlinearity='relu') + Linear."""
    B, T, D = X.shape
    L = len(wih_list)
    M = whh_list[0].shape[0]
    h = [jnp.zeros((B, M), jnp.float32) for _ in range(L)]
    for t in range(T):
        inp = X[:, t, :]
        for l in range(L):
            pre = inp @ wih_list[l].T + h[l] @ whh_list[l].T \
                  + bih_list[l] + bhh_list[l]
            h[l] = jnp.maximum(pre, 0.0)
            inp = h[l]
    return h[-1] @ wfc.T + bfc[None, :]


if __name__ == "__main__":
    # Shapes implied by the module: D=1 (sine values), T=10 timesteps.
    B, T, D = 2, 10, 1        # batch, seq len, input_feature
    L, M, K = 2, 32, 1        # num_layers, hidden_features, out_feature
    Bp, Dp, Kp = 8, 8, 128    # sublane-padded batch/feature, lane-padded fc out
    S = T + L - 1             # wavefront steps
    LM = L * M

    key = jax.random.PRNGKey(0)
    keys = jax.random.split(key, 4 * L + 3)
    scale = 1.0 / jnp.sqrt(jnp.float32(M))   # PyTorch uniform(-1/sqrt(M), 1/sqrt(M))

    def u(k, shape):
        return jax.random.uniform(k, shape, jnp.float32, -scale, scale)

    ki = 0
    wih_list, whh_list, bih_list, bhh_list = [], [], [], []
    for l in range(L):
        in_dim = D if l == 0 else M
        wih_list.append(u(keys[ki], (M, in_dim))); ki += 1
        whh_list.append(u(keys[ki], (M, M)));      ki += 1
        bih_list.append(u(keys[ki], (M,)));        ki += 1
        bhh_list.append(u(keys[ki], (M,)));        ki += 1

    wfc = u(keys[ki], (K, M)); ki += 1            # PyTorch Linear weight (K, M)
    bfc = u(keys[ki], (K,));   ki += 1
    X = jax.random.normal(keys[ki], (B, T, D), jnp.float32)

    # ---- host-side parameter prep (pure weight/layout functions) -----------
    # Block recurrent weight (L*M, L*M).
    w_rec = jnp.zeros((LM, LM), jnp.float32)
    for l in range(L):
        w_rec = w_rec.at[l * M:(l + 1) * M, l * M:(l + 1) * M].set(whh_list[l].T)
        if l >= 1:
            w_rec = w_rec.at[(l - 1) * M:l * M, l * M:(l + 1) * M].set(wih_list[l].T)

    # Layer-0 input weight, wide (L*M)-lane output layout.
    w_in = jnp.zeros((Dp, LM), jnp.float32).at[:D, :M].set(wih_list[0].T)

    # Per-wavefront-step fused-bias schedule: block l active for s >= l
    # (block l zero at s < l also encodes the zero initial hidden state h_l).
    bias_sched = jnp.zeros((S, Bp, LM), jnp.float32)
    for l in range(L):
        bl = bih_list[l] + bhh_list[l]
        bias_sched = bias_sched.at[l:, :, l * M:(l + 1) * M].set(
            jnp.broadcast_to(bl, (S - l, Bp, M)))
    bias_sched = bias_sched.reshape(S * Bp, LM)

    # fc weight/bias: transpose, place in the top-layer row block, lane-pad.
    w_fc = jnp.zeros((LM, Kp), jnp.float32).at[(L - 1) * M:, :K].set(wfc.T)
    b_fc = jnp.zeros((1, Kp), jnp.float32).at[:, :K].set(bfc[None, :])

    # Input: time-major, batch padded B -> Bp, feature padded D -> Dp, plus
    # L-1 zero wavefront steps at the tail so per-step indexing is uniform.
    xp = jnp.zeros((S, Bp, Dp), jnp.float32)
    xp = xp.at[:T, :B, :D].set(jnp.transpose(X, (1, 0, 2)))
    xp = xp.reshape(S * Bp, Dp)

    out_pad = rnn_forward(xp, w_in, bias_sched, w_rec, w_fc, b_fc, bp=Bp, kp=Kp)
    out_pad = jax.block_until_ready(out_pad)
    out = out_pad[:B, :K]          # padded batch rows / lanes are never read

    ref = ref_forward(X, wih_list, whh_list, bih_list, bhh_list, wfc, bfc)

    assert out.shape == (B, K)
    assert jnp.allclose(out, ref, atol=1e-5, rtol=1e-4), (out, ref)

    print("KERNEL_OK")
</pallas_src>

<mosaic_0001>
module attributes {stable_mosaic.version = 11 : i64} {
  func.func @rnn_fc_kernel(%arg0: memref<88x8xf32, #tpu.memory_space<vmem>>, %arg1: memref<8x64xf32, #tpu.memory_space<vmem>>, %arg2: memref<88x64xf32, #tpu.memory_space<vmem>>, %arg3: memref<64x64xf32, #tpu.memory_space<vmem>>, %arg4: memref<64x128xf32, #tpu.memory_space<vmem>>, %arg5: memref<1x128xf32, #tpu.memory_space<vmem>>, %arg6: memref<8x128xf32, #tpu.memory_space<vmem>>) attributes {dimension_semantics = [], scalar_prefetch = 0 : i64, scratch_operands = 0 : i64, tpu.core_type = #tpu.core_type<tc>} {
    %c0 = arith.constant 0 : index
    %c0_0 = arith.constant 0 : index
    %0 = vector.load %arg0[%c0, %c0_0] : memref<88x8xf32, #tpu.memory_space<vmem>>, vector<88x8xf32>
    %c0_1 = arith.constant 0 : index
    %c0_2 = arith.constant 0 : index
    %1 = vector.load %arg1[%c0_1, %c0_2] : memref<8x64xf32, #tpu.memory_space<vmem>>, vector<8x64xf32>
    %cst = arith.constant dense<0.000000e+00> : vector<88x64xf32>
    %2 = tpu.matmul %0, %1, %cst {dimension_numbers = #tpu.dot_dimension_numbers<[1], [0], [0], [1], [0, 0, 1, 1], [], []>} : vector<88x8xf32>, vector<8x64xf32>, vector<88x64xf32> -> vector<88x64xf32>
    %c0_3 = arith.constant 0 : index
    %c0_4 = arith.constant 0 : index
    %3 = vector.load %arg2[%c0_3, %c0_4] : memref<88x64xf32, #tpu.memory_space<vmem>>, vector<88x64xf32>
    %4 = arith.addf %2, %3 : vector<88x64xf32>
    %c0_5 = arith.constant 0 : index
    %c0_6 = arith.constant 0 : index
    %5 = vector.load %arg3[%c0_5, %c0_6] : memref<64x64xf32, #tpu.memory_space<vmem>>, vector<64x64xf32>
    %cst_7 = arith.constant 0.000000e+00 : f32
    %6 = vector.broadcast %cst_7 : f32 to vector<8x64xf32>
    %cst_8 = arith.constant dense<0.000000e+00> : vector<8x64xf32>
    %7 = tpu.matmul %6, %5, %cst_8 {dimension_numbers = #tpu.dot_dimension_numbers<[1], [0], [0], [1], [0, 0, 1, 1], [], []>} : vector<8x64xf32>, vector<64x64xf32>, vector<8x64xf32> -> vector<8x64xf32>
    %8 = vector.extract_strided_slice %4 {offsets = [0, 0], sizes = [8, 64], strides = [1, 1]} : vector<88x64xf32> to vector<8x64xf32>
    %9 = arith.addf %7, %8 : vector<8x64xf32>
    %cst_9 = arith.constant 0.000000e+00 : f32
    %10 = vector.broadcast %cst_9 : f32 to vector<8x64xf32>
    %11 = arith.maximumf %9, %10 : vector<8x64xf32>
    %cst_10 = arith.constant dense<0.000000e+00> : vector<8x64xf32>
    %12 = tpu.matmul %11, %5, %cst_10 {dimension_numbers = #tpu.dot_dimension_numbers<[1], [0], [0], [1], [0, 0, 1, 1], [], []>} : vector<8x64xf32>, vector<64x64xf32>, vector<8x64xf32> -> vector<8x64xf32>
    %13 = vector.extract_strided_slice %4 {offsets = [8, 0], sizes = [8, 64], strides = [1, 1]} : vector<88x64xf32> to vector<8x64xf32>
    %14 = arith.addf %12, %13 : vector<8x64xf32>
    %cst_11 = arith.constant 0.000000e+00 : f32
    %15 = vector.broadcast %cst_11 : f32 to vector<8x64xf32>
    %16 = arith.maximumf %14, %15 : vector<8x64xf32>
    %cst_12 = arith.constant dense<0.000000e+00> : vector<8x64xf32>
    %17 = tpu.matmul %16, %5, %cst_12 {dimension_numbers = #tpu.dot_dimension_numbers<[1], [0], [0], [1], [0, 0, 1, 1], [], []>} : vector<8x64xf32>, vector<64x64xf32>, vector<8x64xf32> -> vector<8x64xf32>
    %18 = vector.extract_strided_slice %4 {offsets = [16, 0], sizes = [8, 64], strides = [1, 1]} : vector<88x64xf32> to vector<8x64xf32>
    %19 = arith.addf %17, %18 : vector<8x64xf32>
    %cst_13 = arith.constant 0.000000e+00 : f32
    %20 = vector.broadcast %cst_13 : f32 to vector<8x64xf32>
    %21 = arith.maximumf %19, %20 : vector<8x64xf32>
    %cst_14 = arith.constant dense<0.000000e+00> : vector<8x64xf32>
    %22 = tpu.matmul %21, %5, %cst_14 {dimension_numbers = #tpu.dot_dimension_numbers<[1], [0], [0], [1], [0, 0, 1, 1], [], []>} : vector<8x64xf32>, vector<64x64xf32>, vector<8x64xf32> -> vector<8x64xf32>
    %23 = vector.extract_strided_slice %4 {offsets = [24, 0], sizes = [8, 64], strides = [1, 1]} : vector<88x64xf32> to vector<8x64xf32>
    %24 = arith.addf %22, %23 : vector<8x64xf32>
    %cst_15 = arith.constant 0.000000e+00 : f32
    %25 = vector.broadcast %cst_15 : f32 to vector<8x64xf32>
    %26 = arith.maximumf %24, %25 : vector<8x64xf32>
    %cst_16 = arith.constant dense<0.000000e+00> : vector<8x64xf32>
    %27 = tpu.matmul %26, %5, %cst_16 {dimension_numbers = #tpu.dot_dimension_numbers<[1], [0], [0], [1], [0, 0, 1, 1], [], []>} : vector<8x64xf32>, vector<64x64xf32>, vector<8x64xf32> -> vector<8x64xf32>
    %28 = vector.extract_strided_slice %4 {offsets = [32, 0], sizes = [8, 64], strides = [1, 1]} : vector<88x64xf32> to vector<8x64xf32>
    %29 = arith.addf %27, %28 : vector<8x64xf32>
    %cst_17 = arith.constant 0.000000e+00 : f32
    %30 = vector.broadcast %cst_17 : f32 to vector<8x64xf32>
    %31 = arith.maximumf %29, %30 : vector<8x64xf32>
    %cst_18 = arith.constant dense<0.000000e+00> : vector<8x64xf32>
    %32 = tpu.matmul %31, %5, %cst_18 {dimension_numbers = #tpu.dot_dimension_numbers<[1], [0], [0], [1], [0, 0, 1, 1], [], []>} : vector<8x64xf32>, vector<64x64xf32>, vector<8x64xf32> -> vector<8x64xf32>
    %33 = vector.extract_strided_slice %4 {offsets = [40, 0], sizes = [8, 64], strides = [1, 1]} : vector<88x64xf32> to vector<8x64xf32>
    %34 = arith.addf %32, %33 : vector<8x64xf32>
    %cst_19 = arith.constant 0.000000e+00 : f32
    %35 = vector.broadcast %cst_19 : f32 to vector<8x64xf32>
    %36 = arith.maximumf %34, %35 : vector<8x64xf32>
    %cst_20 = arith.constant dense<0.000000e+00> : vector<8x64xf32>
    %37 = tpu.matmul %36, %5, %cst_20 {dimension_numbers = #tpu.dot_dimension_numbers<[1], [0], [0], [1], [0, 0, 1, 1], [], []>} : vector<8x64xf32>, vector<64x64xf32>, vector<8x64xf32> -> vector<8x64xf32>
    %38 = vector.extract_strided_slice %4 {offsets = [48, 0], sizes = [8, 64], strides = [1, 1]} : vector<88x64xf32> to vector<8x64xf32>
    %39 = arith.addf %37, %38 : vector<8x64xf32>
    %cst_21 = arith.constant 0.000000e+00 : f32
    %40 = vector.broadcast %cst_21 : f32 to vector<8x64xf32>
    %41 = arith.maximumf %39, %40 : vector<8x64xf32>
    %cst_22 = arith.constant dense<0.000000e+00> : vector<8x64xf32>
    %42 = tpu.matmul %41, %5, %cst_22 {dimension_numbers = #tpu.dot_dimension_numbers<[1], [0], [0], [1], [0, 0, 1, 1], [], []>} : vector<8x64xf32>, vector<64x64xf32>, vector<8x64xf32> -> vector<8x64xf32>
    %43 = vector.extract_strided_slice %4 {offsets = [56, 0], sizes = [8, 64], strides = [1, 1]} : vector<88x64xf32> to vector<8x64xf32>
    %44 = arith.addf %42, %43 : vector<8x64xf32>
    %cst_23 = arith.constant 0.000000e+00 : f32
    %45 = vector.broadcast %cst_23 : f32 to vector<8x64xf32>
    %46 = arith.maximumf %44, %45 : vector<8x64xf32>
    %cst_24 = arith.constant dense<0.000000e+00> : vector<8x64xf32>
    %47 = tpu.matmul %46, %5, %cst_24 {dimension_numbers = #tpu.dot_dimension_numbers<[1], [0], [0], [1], [0, 0, 1, 1], [], []>} : vector<8x64xf32>, vector<64x64xf32>, vector<8x64xf32> -> vector<8x64xf32>
    %48 = vector.extract_strided_slice %4 {offsets = [64, 0], sizes = [8, 64], strides = [1, 1]} : vector<88x64xf32> to vector<8x64xf32>
    %49 = arith.addf %47, %48 : vector<8x64xf32>
    %cst_25 = arith.constant 0.000000e+00 : f32
    %50 = vector.broadcast %cst_25 : f32 to vector<8x64xf32>
    %51 = arith.maximumf %49, %50 : vector<8x64xf32>
    %cst_26 = arith.constant dense<0.000000e+00> : vector<8x64xf32>
    %52 = tpu.matmul %51, %5, %cst_26 {dimension_numbers = #tpu.dot_dimension_numbers<[1], [0], [0], [1], [0, 0, 1, 1], [], []>} : vector<8x64xf32>, vector<64x64xf32>, vector<8x64xf32> -> vector<8x64xf32>
    %53 = vector.extract_strided_slice %4 {offsets = [72, 0], sizes = [8, 64], strides = [1, 1]} : vector<88x64xf32> to vector<8x64xf32>
    %54 = arith.addf %52, %53 : vector<8x64xf32>
    %cst_27 = arith.constant 0.000000e+00 : f32
    %55 = vector.broadcast %cst_27 : f32 to vector<8x64xf32>
    %56 = arith.maximumf %54, %55 : vector<8x64xf32>
    %cst_28 = arith.constant dense<0.000000e+00> : vector<8x64xf32>
    %57 = tpu.matmul %56, %5, %cst_28 {dimension_numbers = #tpu.dot_dimension_numbers<[1], [0], [0], [1], [0, 0, 1, 1], [], []>} : vector<8x64xf32>, vector<64x64xf32>, vector<8x64xf32> -> vector<8x64xf32>
    %58 = vector.extract_strided_slice %4 {offsets = [80, 0], sizes = [8, 64], strides = [1, 1]} : vector<88x64xf32> to vector<8x64xf32>
    %59 = arith.addf %57, %58 : vector<8x64xf32>
    %cst_29 = arith.constant 0.000000e+00 : f32
    %60 = vector.broadcast %cst_29 : f32 to vector<8x64xf32>
    %61 = arith.maximumf %59, %60 : vector<8x64xf32>
    %c0_30 = arith.constant 0 : index
    %c0_31 = arith.constant 0 : index
    %62 = vector.load %arg4[%c0_30, %c0_31] : memref<64x128xf32, #tpu.memory_space<vmem>>, vector<64x128xf32>
    %cst_32 = arith.constant dense<0.000000e+00> : vector<8x128xf32>
    %63 = tpu.matmul %61, %62, %cst_32 {dimension_numbers = #tpu.dot_dimension_numbers<[1], [0], [0], [1], [0, 0, 1, 1], [], []>} : vector<8x64xf32>, vector<64x128xf32>, vector<8x128xf32> -> vector<8x128xf32>
    %c0_33 = arith.constant 0 : index
    %c0_34 = arith.constant 0 : index
    %64 = vector.load %arg5[%c0_33, %c0_34] : memref<1x128xf32, #tpu.memory_space<vmem>>, vector<1x128xf32>
    %65 = vector.broadcast %64 : vector<1x128xf32> to vector<8x128xf32>
    %66 = arith.addf %63, %65 : vector<8x128xf32>
    %c0_35 = arith.constant 0 : index
    %c0_36 = arith.constant 0 : index
    %67 = vector.load %arg6[%c0_35, %c0_36] : memref<8x128xf32, #tpu.memory_space<vmem>>, vector<8x128xf32>
    tpu.vector_store %arg6[%c0_35, %c0_36], %66 {strides = array<i32>} : memref<8x128xf32, #tpu.memory_space<vmem>>, vector<8x128xf32>,
    return
  }
}

</mosaic_0001>

<bundles_post_ra>
// kernel: tpu_custom_call.1
= control target key start
LH: loop header
LB: loop body
LE: loop exit
PB: predicated region body
PF: predicated region fallthrough
CT: control target
= control target key end

     0   :  { %vm47_vm0 = vcmask 64512   ;;  %v1731_v2 = vmov 0.0   ;;  %vm1732_vm1 = vmmov 0   ;;  %v1733_v7 = vmov 0.0|0.0   ;;  %s2093_s0 = inlined_call_operand.vmem [shape: f32[88,8], index: 0, kind: input, shape index: {}]   ;;  %s2094_s1 = inlined_call_operand.vmem [shape: f32[8,64], index: 1, kind: input, shape index: {}]   ;;  %s2095_s2 = inlined_call_operand.vmem [shape: f32[88,64], index: 2, kind: input, shape index: {}]   ;;  %s2096_s3 = inlined_call_operand.vmem [shape: f32[64,64], index: 3, kind: input, shape index: {}]   ;;  %s2097_s4 = inlined_call_operand.vmem [shape: f32[64,128], index: 4, kind: input, shape index: {}]   ;;  %s2098_s5 = inlined_call_operand.vmem [shape: f32[1,128], index: 5, kind: input, shape index: {}]   ;;  %s2099_s6 = inlined_call_operand.hbm [shape: f32[8,128], index: 6, kind: output, shape index: {}]  }
   0x1   :  { %v35_v0 = vld [vmem:[%s2094_s1] sm:$0xff]  ;;  %1270 = vmatprep.subr.mxu1 %v1731_v2  ;;  %1272 = vmatprep.mubr.msk.f32.mxu1 %vm1732_vm1, %v1731_v2  ;;  %v202_v4 = vld [vmem:[%s2096_s3 + $0x8] sm:$0xff]  ;;  %v203_v6 = vld [vmem:[%s2096_s3 + $0x10] sm:$0xff] }
   0x2   :  { %v24_v1 = vld [vmem:[%s2093_s0] sm:$0xff]  ;;  %1271 = vmatpush3.msra.mxu1 %v35_v0  ;;  %1581 = vmatprep.subr.bf16.mxu0 %v1733_v7  ;;  %v204_v8 = vld [vmem:[%s2096_s3 + $0x18] sm:$0xff]  ;;  %v25_v9 = vld [vmem:[%s2093_s0 + $0x8] sm:$0xff] }
   0x3   :  { %v201_v3 = vld [vmem:[%s2096_s3] sm:$0xff]  ;;  %1273 = vmatmul.mubr.msk.f32.vlgmr.msra.gmra.mrb[0].mxu1 %vm47_vm0, %v24_v1  ;;  %1533 = vmatprep.subr.bf16.mxu1 %v1733_v7  ;;  %v1802_v10 = vpack.c.bf16 %v204_v8, %v203_v6  ;;  %v206_v12 = vld [vmem:[%s2096_s3 + $0x28] sm:$0xff] }
   0x4   :  { %v1785_v5 = vpack.c.bf16 %v202_v4, %v201_v3  ;;  %1275 = vmatprep.mubr.msk.f32.mxu1 %vm1732_vm1, %v1731_v2  ;;  %v205_v11 = vld [vmem:[%s2096_s3 + $0x20] sm:$0xff]  ;;  %1397 = vmatprep.mubr.msk.f32.mxu0 %vm1732_vm1, %v1731_v2 }
   0x6   :  { %1535 = vmatpush3.bf16.msra.mxu1 %v1785_v5  ;;  %1583 = vmatpush3.bf16.msra.mxu0 %v1785_v5 }
   0x7   :  { %1536 = vmatprep.subr.bf16.mxu1 %v1733_v7  ;;  %1584 = vmatprep.subr.bf16.mxu0 %v1733_v7 }
   0x8   :  { %1276 = vmatmul.mubr.msk.f32.gmra.mrb[2].mxu1 %vm47_vm0, %v25_v9 }
   0x9   :  { %11 = vsyncpa [#allocation3], 0  ;;  %1278 = vmatprep.mubr.msk.f32.mxu1 %vm1732_vm1, %v1731_v2  ;;  %v26_v13 = vld [vmem:[%s2093_s0 + $0x10] sm:$0xff]  ;;  %v1822_v14 = vpack.c.bf16 %v206_v12, %v205_v11  ;;  %v208_v16 = vld [vmem:[%s2096_s3 + $0x38] sm:$0xff]  ;;  %vm209_vm2 = vcmask 523264  }
   0xa   :  { %1538 = vmatpush3.bf16.msra.mxu1 %v1802_v10  ;;  %v207_v15 = vld [vmem:[%s2096_s3 + $0x30] sm:$0xff]  ;;  %1586 = vmatpush3.bf16.msra.mxu0 %v1802_v10  ;;  %v27_v17 = vld [vmem:[%s2093_s0 + $0x18] sm:$0xff]  ;;  %v28_v19 = vld [vmem:[%s2093_s0 + $0x20] sm:$0xff]  ;;  %s1734_s3 = smov [#allocation2]  }
   0xb   :  { %1539 = vmatprep.subr.bf16.mxu1 %v1733_v7  ;;  %1587 = vmatprep.subr.bf16.mxu0 %v1733_v7  ;;  %v1840_v18 = vpack.c.bf16 %v208_v16, %v207_v15  ;;  %v29_v20 = vld [vmem:[%s2093_s0 + $0x28] sm:$0xff]  ;;  %v30_v21 = vld [vmem:[%s2093_s0 + $0x30] sm:$0xff]  ;;  %v31_v22 = vld [vmem:[%s2093_s0 + $0x38] sm:$0xff] }
   0xc   :  { %1279 = vmatmul.mubr.msk.f32.gmra.mrb[4].mxu1 %vm47_vm0, %v26_v13  ;;  %v32_v23 = vld [vmem:[%s2093_s0 + $0x40] sm:$0xff]  ;;  %v33_v24 = vld [vmem:[%s2093_s0 + $0x48] sm:$0xff]  ;;  %v34_v25 = vld [vmem:[%s2093_s0 + $0x50] sm:$0xff] }
   0xd   :  { %1281 = vmatprep.mubr.msk.f32.mxu1 %vm1732_vm1, %v1731_v2  ;;  %v36_v40 = vld [vmem:[%s2095_s2] sm:$0xff]  ;;  %v37_v45 = vld [vmem:[%s2095_s2 + $0x8] sm:$0xff]  ;;  %v38_v50 = vld [vmem:[%s2095_s2 + $0x10] sm:$0xff] }
   0xe   :  { %1541 = vmatpush3.bf16.msra.mxu1 %v1822_v14  ;;  %1589 = vmatpush3.bf16.msra.mxu0 %v1822_v14  ;;  %v39_v55 = vld [vmem:[%s2095_s2 + $0x18] sm:$0xff]  ;;  %v40_v60 = vld [vmem:[%s2095_s2 + $0x20] sm:$0xff]  ;;  %v41_v3 = vld [vmem:[%s2095_s2 + $0x28] sm:$0xff] }
   0xf   :  { %1542 = vmatprep.subr.bf16.mxu1 %v1733_v7  ;;  %1590 = vmatprep.subr.bf16.mxu0 %v1733_v7  ;;  %v42_v12 = vld [vmem:[%s2095_s2 + $0x30] sm:$0xff] }
  0x10   :  { %1282 = vmatmul.mubr.msk.f32.gmra.mrb[6].mxu1 %vm47_vm0, %v27_v17 }
  0x11   :  { %1284 = vmatprep.mubr.msk.f32.mxu1 %vm1732_vm1, %v1731_v2 }
  0x12   :  { %1544 = vmatpush3.bf16.msra.mxu1 %v1840_v18  ;;  %1592 = vmatpush3.bf16.msra.mxu0 %v1840_v18 }
  0x13   :  { %1545 = vmatprep.subr.bf16.mxu1 %v1733_v7  ;;  %1593 = vmatprep.subr.bf16.mxu0 %v1733_v7 }
  0x14   :  { %1285 = vmatmul.mubr.msk.f32.gmra.mrb[8].mxu1 %vm47_vm0, %v28_v19 }
  0x15   :  { %1287 = vmatprep.mubr.msk.f32.mxu1 %vm1732_vm1, %v1731_v2 }
  0x18   :  { %1288 = vmatmul.mubr.msk.f32.gmra.mrb[10].mxu1 %vm47_vm0, %v29_v20  ;;  %v43_v20 = vld [vmem:[%s2095_s2 + $0x38] sm:$0xff] }
  0x19   :  { %1290 = vmatprep.mubr.msk.f32.mxu1 %vm1732_vm1, %v1731_v2 }
  0x1c   :  { %1291 = vmatmul.mubr.msk.f32.gmra.mrb[12].mxu1 %vm47_vm0, %v30_v21 }
  0x1d   :  { %1293 = vmatprep.mubr.msk.f32.mxu1 %vm1732_vm1, %v1731_v2 }
  0x20   :  { %1294 = vmatmul.mubr.msk.f32.gmra.mrb[14].mxu1 %vm47_vm0, %v31_v22 }
  0x21   :  { %1296 = vmatprep.mubr.msk.f32.mxu1 %vm1732_vm1, %v1731_v2 }
  0x24   :  { %1297 = vmatmul.mubr.msk.f32.gmra.mrb[16].mxu1 %vm47_vm0, %v32_v23 }
  0x25   :  { %1299 = vmatprep.mubr.msk.f32.mxu1 %vm1732_vm1, %v1731_v2 }
  0x28   :  { %1300 = vmatmul.mubr.msk.f32.gmra.mrb[18].mxu1 %vm47_vm0, %v33_v24 }
  0x29   :  { %1302 = vmatprep.mubr.msk.f32.mxu1 %vm1732_vm1, %v1731_v2 }
  0x2c   :  { %1303 = vmatmul.mubr.msk.f32.gmra.mrb[20].mxu1 %vm47_vm0, %v34_v25 }
  0x2d   :  { %1321 = vmatprep.mubr.msk.f32.mxu1 %vm1732_vm1, %v1731_v2 }
  0x30   :  { %1322 = vmatmul.mubr.f32.vlgmr.msra.gmra.mrb[0].mxu1 %v1731_v2 }
  0x31   :  { %1547 = vmatpush3.bf16.msra.mxu1 %v1785_v5  ;;  %1340 = vmatprep.mubr.msk.f32.mxu1 %vm1732_vm1, %v1731_v2 }
  0x32   :  { %1548 = vmatprep.subr.bf16.mxu1 %v1733_v7 }
  0x35   :  { %1550 = vmatpush3.bf16.msra.mxu1 %v1802_v10 }
  0x36   :  { %1551 = vmatprep.subr.bf16.mxu1 %v1733_v7 }
  0x39   :  { %1553 = vmatpush3.bf16.msra.mxu1 %v1822_v14 }
  0x3a   :  { %1554 = vmatprep.subr.bf16.mxu1 %v1733_v7 }
  0x3d   :  { %1556 = vmatpush3.bf16.msra.mxu1 %v1840_v18 }
  0x3e   :  { %1557 = vmatprep.subr.bf16.mxu1 %v1733_v7 }
  0xe7   :  { %v1905_v26 = vpop.f32.mrb[8].mxu1 }
  0xe8   :  { %v1286_v27 = vpop.f32.mrb[9].mxu1  ;;  %v168_v61 = vadd.f32 %v1905_v26, %v40_v60  ;;  %v44_v26 = vld [vmem:[%s2095_s2 + $0x40] sm:$0xff] }
  0xeb   :  { %v1907_v28 = vpop.f32.mrb[10].mxu1 }
  0xec   :  { %v1289_v29 = vpop.f32.mrb[11].mxu1  ;;  %v173_v4 = vadd.f32 %v1907_v28, %v41_v3 }
  0xef   :  { %v1909_v30 = vpop.f32.mrb[12].mxu1 }
  0xf0   :  { %v1292_v31 = vpop.f32.mrb[13].mxu1  ;;  %v178_v13 = vadd.f32 %v1909_v30, %v42_v12 }
  0xf3   :  { %v1911_v32 = vpop.f32.mrb[14].mxu1 }
  0xf4   :  { %v1295_v33 = vpop.f32.mrb[15].mxu1  ;;  %v183_v21 = vadd.f32 %v1911_v32, %v43_v20  ;;  %v1024_v32 = vld [vmem:[%s2097_s4] sm:$0xff] }
  0xf7   :  { %v1913_v34 = vpop.f32.mrb[16].mxu1 }
  0xf8   :  { %v1298_v35 = vpop.f32.mrb[17].mxu1  ;;  %v188_v27 = vadd.f32 %v1913_v34, %v44_v26  ;;  %v1029_v34 = vld [vmem:[%s2097_s4 + $0x28] sm:$0xff] }
  0xfb   :  { %v1915_v36 = vpop.f32.mrb[18].mxu1 }
  0xfc   :  { %v1301_v37 = vpop.f32.mrb[19].mxu1 }
  0xfd   :  { %v45_v37 = vld [vmem:[%s2095_s2 + $0x48] sm:$0xff] }
  0xff   :  { %v1917_v38 = vpop.f32.mrb[20].mxu1 }
 0x100   :  { %v1304_v39 = vpop.f32.mrb[21].mxu1 }
 0x101   :  { %v193_v39 = vadd.f32 %v1915_v36, %v45_v37  ;;  %v46_v36 = vld [vmem:[%s2095_s2 + $0x50] sm:$0xff] }
 0x103   :  { %v279_v41 = vpop.f32.mrb[0].mxu1 }
 0x104   :  { %v1677_v42 = vadd.f32 %v279_v41, %v36_v40  ;;  %v1323_v43 = vpop.f32.mrb[1].mxu1 }
 0x106   :  { %v283_v44 = vmax.f32 %v1677_v42, 0.0 }
 0x108   :  { %1341 = vmatmul.mubr.msk.f32.vlgmr.msra.gmra.mrb[2].mxu1 %vm209_vm2, %v283_v44  ;;  %v1030_v44 = vld [vmem:[%s2097_s4 + $0x30] sm:$0xff] }
 0x109   :  { %1559 = vmatpush3.bf16.msra.mxu1 %v1785_v5  ;;  %1359 = vmatprep.mubr.msk.f32.mxu1 %vm1732_vm1, %v1731_v2 }
 0x10a   :  { %1560 = vmatprep.subr.bf16.mxu1 %v1733_v7 }
 0x10d   :  { %1562 = vmatpush3.bf16.msra.mxu1 %v1802_v10 }
 0x10e   :  { %1563 = vmatprep.subr.bf16.mxu1 %v1733_v7 }
 0x111   :  { %1565 = vmatpush3.bf16.msra.mxu1 %v1822_v14 }
 0x112   :  { %1566 = vmatprep.subr.bf16.mxu1 %v1733_v7 }
 0x115   :  { %1568 = vmatpush3.bf16.msra.mxu1 %v1840_v18 }
 0x116   :  { %1569 = vmatprep.subr.bf16.mxu1 %v1733_v7 }
 0x1db   :  { %v353_v46 = vpop.f32.mrb[2].mxu1 }
 0x1dc   :  { %v1678_v47 = vadd.f32 %v353_v46, %v37_v45  ;;  %v1342_v48 = vpop.f32.mrb[3].mxu1  ;;  %v198_v46 = vadd.f32 %v1917_v38, %v46_v36 }
 0x1de   :  { %v357_v49 = vmax.f32 %v1678_v47, 0.0 }
 0x1e0   :  { %1360 = vmatmul.mubr.msk.f32.vlgmr.msra.gmra.mrb[4].mxu1 %vm209_vm2, %v357_v49 }
 0x1e1   :  { %1571 = vmatpush3.bf16.msra.mxu1 %v1785_v5  ;;  %1378 = vmatprep.mubr.msk.f32.mxu1 %vm1732_vm1, %v1731_v2 }
 0x1e2   :  { %1572 = vmatprep.subr.bf16.mxu1 %v1733_v7 }
 0x1e5   :  { %1574 = vmatpush3.bf16.msra.mxu1 %v1802_v10 }
 0x1e6   :  { %1575 = vmatprep.subr.bf16.mxu1 %v1733_v7 }
 0x1e9   :  { %1577 = vmatpush3.bf16.msra.mxu1 %v1822_v14 }
 0x1ea   :  { %1578 = vmatprep.subr.bf16.mxu1 %v1733_v7 }
 0x1ed   :  { %1580 = vmatpush3.bf16.msra.mxu1 %v1840_v18 }
 0x1ee   :  { %1665 = vmatprep.subr.bf16.mxu1 %v1733_v7 }
 0x2b3   :  { %v427_v51 = vpop.f32.mrb[4].mxu1 }
 0x2b4   :  { %v1679_v52 = vadd.f32 %v427_v51, %v38_v50  ;;  %v1361_v53 = vpop.f32.mrb[5].mxu1  ;;  %v1148_v51 = vld [vmem:[%s2098_s5] ss:$0 sm:$0xff] }
 0x2b6   :  { %v431_v54 = vmax.f32 %v1679_v52, 0.0 }
 0x2b8   :  { %1379 = vmatmul.mubr.msk.f32.vlgmr.msra.gmra.mrb[6].mxu1 %vm209_vm2, %v431_v54 }
 0x2b9   :  { %1530 = vmatprep.mubr.msk.f32.mxu1 %vm1732_vm1, %v1731_v2 }
 0x38b   :  { %v501_v56 = vpop.f32.mrb[6].mxu1 }
 0x38c   :  { %v1680_v57 = vadd.f32 %v501_v56, %v39_v55  ;;  %v1380_v58 = vpop.f32.mrb[7].mxu1 }
 0x38e   :  { %v505_v59 = vmax.f32 %v1680_v57, 0.0 }
 0x390   :  { %1398 = vmatmul.mubr.msk.f32.vlgmr.msra.gmra.mrb[0].mxu0 %vm209_vm2, %v505_v59 }
 0x391   :  { %1595 = vmatpush3.bf16.msra.mxu0 %v1785_v5  ;;  %1416 = vmatprep.mubr.msk.f32.mxu0 %vm1732_vm1, %v1731_v2 }
 0x392   :  { %1596 = vmatprep.subr.bf16.mxu0 %v1733_v7 }
 0x395   :  { %1598 = vmatpush3.bf16.msra.mxu0 %v1802_v10 }
 0x396   :  { %1599 = vmatprep.subr.bf16.mxu0 %v1733_v7 }
 0x399   :  { %1601 = vmatpush3.bf16.msra.mxu0 %v1822_v14 }
 0x39a   :  { %1602 = vmatprep.subr.bf16.mxu0 %v1733_v7 }
 0x39d   :  { %1604 = vmatpush3.bf16.msra.mxu0 %v1840_v18 }
 0x39e   :  { %1605 = vmatprep.subr.bf16.mxu0 %v1733_v7 }
 0x463   :  { %v575_v62 = vpop.f32.mrb[0].mxu0 }
 0x464   :  { %v576_v63 = vadd.f32 %v575_v62, %v168_v61  ;;  %v1399_v0 = vpop.f32.mrb[1].mxu0 }
 0x466   :  { %v579_v1 = vmax.f32 %v576_v63, 0.0 }
 0x468   :  { %1417 = vmatmul.mubr.msk.f32.vlgmr.msra.gmra.mrb[2].mxu0 %vm209_vm2, %v579_v1 }
 0x469   :  { %1607 = vmatpush3.bf16.msra.mxu0 %v1785_v5  ;;  %1435 = vmatprep.mubr.msk.f32.mxu0 %vm1732_vm1, %v1731_v2 }
 0x46a   :  { %1608 = vmatprep.subr.bf16.mxu0 %v1733_v7 }
 0x46d   :  { %1610 = vmatpush3.bf16.msra.mxu0 %v1802_v10 }
 0x46e   :  { %1611 = vmatprep.subr.bf16.mxu0 %v1733_v7 }
 0x471   :  { %1613 = vmatpush3.bf16.msra.mxu0 %v1822_v14 }
 0x472   :  { %1614 = vmatprep.subr.bf16.mxu0 %v1733_v7 }
 0x475   :  { %1616 = vmatpush3.bf16.msra.mxu0 %v1840_v18 }
 0x476   :  { %1617 = vmatprep.subr.bf16.mxu0 %v1733_v7 }
 0x53b   :  { %v649_v6 = vpop.f32.mrb[2].mxu0 }
 0x53c   :  { %v650_v8 = vadd.f32 %v649_v6, %v173_v4  ;;  %v1418_v9 = vpop.f32.mrb[3].mxu0 }
 0x53e   :  { %v653_v11 = vmax.f32 %v650_v8, 0.0 }
 0x540   :  { %1436 = vmatmul.mubr.msk.f32.vlgmr.msra.gmra.mrb[4].mxu0 %vm209_vm2, %v653_v11 }
 0x541   :  { %1619 = vmatpush3.bf16.msra.mxu0 %v1785_v5  ;;  %1454 = vmatprep.mubr.msk.f32.mxu0 %vm1732_vm1, %v1731_v2 }
 0x542   :  { %1620 = vmatprep.subr.bf16.mxu0 %v1733_v7 }
 0x545   :  { %1622 = vmatpush3.bf16.msra.mxu0 %v1802_v10 }
 0x546   :  { %1623 = vmatprep.subr.bf16.mxu0 %v1733_v7 }
 0x549   :  { %1625 = vmatpush3.bf16.msra.mxu0 %v1822_v14 }
 0x54a   :  { %1626 = vmatprep.subr.bf16.mxu0 %v1733_v7 }
 0x54d   :  { %1628 = vmatpush3.bf16.msra.mxu0 %v1840_v18 }
 0x54e   :  { %1629 = vmatprep.subr.bf16.mxu0 %v1733_v7 }
 0x613   :  { %v723_v15 = vpop.f32.mrb[4].mxu0 }
 0x614   :  { %v724_v16 = vadd.f32 %v723_v15, %v178_v13  ;;  %v1437_v17 = vpop.f32.mrb[5].mxu0 }
 0x616   :  { %v727_v19 = vmax.f32 %v724_v16, 0.0 }
 0x618   :  { %1455 = vmatmul.mubr.msk.f32.vlgmr.msra.gmra.mrb[6].mxu0 %vm209_vm2, %v727_v19 }
 0x619   :  { %1631 = vmatpush3.bf16.msra.mxu0 %v1785_v5  ;;  %1473 = vmatprep.mubr.msk.f32.mxu0 %vm1732_vm1, %v1731_v2 }
 0x61a   :  { %1632 = vmatprep.subr.bf16.mxu0 %v1733_v7 }
 0x61d   :  { %1634 = vmatpush3.bf16.msra.mxu0 %v1802_v10 }
 0x61e   :  { %1635 = vmatprep.subr.bf16.mxu0 %v1733_v7 }
 0x621   :  { %1637 = vmatpush3.bf16.msra.mxu0 %v1822_v14 }
 0x622   :  { %1638 = vmatprep.subr.bf16.mxu0 %v1733_v7 }
 0x625   :  { %1640 = vmatpush3.bf16.msra.mxu0 %v1840_v18 }
 0x626   :  { %1641 = vmatprep.subr.bf16.mxu0 %v1733_v7 }
 0x6eb   :  { %v797_v22 = vpop.f32.mrb[6].mxu0 }
 0x6ec   :  { %v798_v23 = vadd.f32 %v797_v22, %v183_v21  ;;  %v1456_v24 = vpop.f32.mrb[7].mxu0 }
 0x6ee   :  { %v801_v25 = vmax.f32 %v798_v23, 0.0 }
 0x6f0   :  { %1474 = vmatmul.mubr.msk.f32.vlgmr.msra.gmra.mrb[8].mxu0 %vm209_vm2, %v801_v25 }
 0x6f1   :  { %1643 = vmatpush3.bf16.msra.mxu0 %v1785_v5  ;;  %1492 = vmatprep.mubr.msk.f32.mxu0 %vm1732_vm1, %v1731_v2 }
 0x6f2   :  { %1644 = vmatprep.subr.bf16.mxu0 %v1733_v7 }
 0x6f5   :  { %1646 = vmatpush3.bf16.msra.mxu0 %v1802_v10 }
 0x6f6   :  { %1647 = vmatprep.subr.bf16.mxu0 %v1733_v7 }
 0x6f9   :  { %1649 = vmatpush3.bf16.msra.mxu0 %v1822_v14 }
 0x6fa   :  { %1650 = vmatprep.subr.bf16.mxu0 %v1733_v7 }
 0x6fd   :  { %1652 = vmatpush3.bf16.msra.mxu0 %v1840_v18 }
 0x6fe   :  { %1653 = vmatprep.subr.bf16.mxu0 %v1733_v7 }
 0x7c3   :  { %v871_v28 = vpop.f32.mrb[8].mxu0 }
 0x7c4   :  { %v872_v29 = vadd.f32 %v871_v28, %v188_v27  ;;  %v1475_v30 = vpop.f32.mrb[9].mxu0 }
 0x7c6   :  { %v875_v31 = vmax.f32 %v872_v29, 0.0 }
 0x7c8   :  { %1493 = vmatmul.mubr.msk.f32.vlgmr.msra.gmra.mrb[10].mxu0 %vm209_vm2, %v875_v31 }
 0x7c9   :  { %1655 = vmatpush3.bf16.msra.mxu0 %v1785_v5  ;;  %1511 = vmatprep.mubr.msk.f32.mxu0 %vm1732_vm1, %v1731_v2  ;;  %v1025_v2 = vld [vmem:[%s2097_s4 + $0x8] sm:$0xff]  ;;  %v1026_v5 = vld [vmem:[%s2097_s4 + $0x10] sm:$0xff] }
 0x7ca   :  { %1656 = vmatprep.subr.bf16.mxu0 %v1733_v7 }
 0x7cd   :  { %1658 = vmatpush3.bf16.msra.mxu0 %v1802_v10  ;;  %v1666_v10 = vpack.c.bf16 %v1025_v2, %v1024_v32 }
 0x7ce   :  { %1659 = vmatprep.subr.bf16.mxu0 %v1733_v7 }
 0x7cf   :  { %1667 = vmatpush3.bf16.msra.mxu1 %v1666_v10 }
 0x7d0   :  { %1668 = vmatprep.subr.bf16.mxu1 %v1733_v7 }
 0x7d1   :  { %1661 = vmatpush3.bf16.msra.mxu0 %v1822_v14  ;;  %v1027_v14 = vld [vmem:[%s2097_s4 + $0x18] sm:$0xff] }
 0x7d2   :  { %1662 = vmatprep.subr.bf16.mxu0 %v1733_v7  ;;  %v1669_v33 = vpack.c.bf16 %v1027_v14, %v1026_v5 }
 0x7d4   :  { %1670 = vmatpush3.bf16.msra.mxu1 %v1669_v33 }
 0x7d5   :  { %1664 = vmatpush3.bf16.msra.mxu0 %v1840_v18  ;;  %v1028_v18 = vld [vmem:[%s2097_s4 + $0x20] sm:$0xff]  ;;  %1671 = vmatprep.subr.bf16.mxu1 %v1733_v7 }
 0x7d6   :  { %v1672_v35 = vpack.c.bf16 %v1029_v34, %v1028_v18 }
 0x7d8   :  { %1673 = vmatpush3.bf16.msra.mxu1 %v1672_v35 }
 0x7d9   :  { %1674 = vmatprep.subr.bf16.mxu1 %v1733_v7  ;;  %v1031_v7 = vld [vmem:[%s2097_s4 + $0x38] sm:$0xff]  ;;  %s1119_s4 = sshll.u32 %s1734_s3, 4  ;;  %s1120_s4 = int_to_ptr.vmem [resolvable:$true] %s1119_s4 }
 0x7da   :  { %v1675_v45 = vpack.c.bf16 %v1031_v7, %v1030_v44  ;;  %s1707_s2 = scalar_lea.vmem %s1120_s4, 128  ;;  %p1712_p1 = scmp.lt.s32.totalorder %s1120_s4, %s1120_s4 }
 0x7db   :  { %p1708_p0 = scmp.ne.s32.totalorder %s1120_s4, %s1707_s2  ;;  %p1713_p2 = scmp.lt.s32.totalorder %s1707_s2, %s1707_s2 }
 0x7dc   :  { %1676 = vmatpush3.bf16.msra.mxu1 %v1675_v45 }
 0x7dd   :  { %p1714_p3 = por %p1713_p2, %p1712_p1 }
 0x7df   :  { %p1715_p4 = pnand %p1714_p3, %p1708_p0 }
 0x89b   :  { %v945_v40 = vpop.f32.mrb[10].mxu0 }
 0x89c   :  { %v946_v41 = vadd.f32 %v945_v40, %v193_v39  ;;  %v1494_v42 = vpop.f32.mrb[11].mxu0 }
 0x89e   :  { %v949_v43 = vmax.f32 %v946_v41, 0.0 }
 0x8a0   :  { %1512 = vmatmul.mubr.msk.f32.vlgmr.msra.gmra.mrb[12].mxu0 %vm209_vm2, %v949_v43 }
 0x973   :  { %v1019_v47 = vpop.f32.mrb[12].mxu0 }
 0x974   :  { %v1020_v48 = vadd.f32 %v1019_v47, %v198_v46  ;;  %v1513_v49 = vpop.f32.mrb[13].mxu0 }
 0x976   :  { %v1023_v50 = vmax.f32 %v1020_v48, 0.0 }
 0x978   :  { %1531 = vmatmul.mubr.msk.f32.vlgmr.msra.gmra.mrb[22].mxu1 %vm209_vm2, %v1023_v50 }
 0xa4b   :  { %v1108_v52 = vpop.f32.mrb[22].mxu1 }
 0xa4c   :  { %v1109_v53 = vadd.f32 %v1148_v51, %v1108_v52  ;;  %v1532_v54 = vpop.f32.mrb[23].mxu1 }
 0xa4e   :  { %1112 = vst [vmem:[#allocation2] sm:$0xff] %v1109_v53 }
 0xa4f   :  { %1718 = shalt.err (!%p1715_p4)
}
 0xa50   :  { %s1719_s24 = scalar_lea.hbm %s2099_s6, 128 }
 0xa51   :  { %p1720_p5 = scmp.ne.s32.totalorder %s2099_s6, %s1719_s24  ;;  %p1723_p6 = scmp.lt.u32.totalorder %s1719_s24, %s2099_s6 }
 0xa53   :  { %p1725_p7 = pnand %p1723_p6, %p1720_p5 }
 0xa55   :  { %1728 = shalt.err (!%p1725_p7)
}
 0xa56   :  { %1122 = dma.vmem_to_hbm [thread:$0]  %s1120_s4, 128, %s2099_s6, [#allocation3]  }
 0xa57   :  { %1729 = dma.done.wait [#allocation3], 128  }
 0xa58   :  { %1730 = vsyncadd [#allocation3], 4294967168 }
 0xa59   :  { %1126 = vsyncpa [#allocation3], 1 }

</bundles_post_ra>
